<compile_context>
chip_gen: v5e
topology: v5e:2x2
jax: 0.10.0
libtpu: 0.0.40
codegen_flags: <defaults>
</compile_context>

<pallas_src>
import functools

import jax
import jax.numpy as jnp
from jax.experimental import pallas as pl
from jax.experimental.pallas import tpu as pltpu

EPS = 1e-6


def _round_up(x, m):
    return ((x + m - 1) // m) * m


def _device_kind():
    try:
        return jax.devices()[0].device_kind.lower()
    except Exception:
        return ""


def _is_v5e(kind):
    return ("v5 lite" in kind) or ("v5e" in kind) or ("v5litepod" in kind)


def _default_matmul_tiles():
    """MXU-native tiles: 128 on v5e, 256 on v6e/v7x (clamped to actual dims)."""
    if _is_v5e(_device_kind()):
        return 128, 128, 512
    return 256, 256, 512


def _ew_bf16():
    """bf16 elementwise (softmax exp / GELU) only where the VPU/EUP has it."""
    kind = _device_kind()
    return ("v6" in kind) or ("v7" in kind)


def _vmem_cap_bytes():
    """v7x has 64 MiB physical VMEM per TC; v5e/v6e have 128 MiB."""
    kind = _device_kind()
    return (56 << 20) if "v7" in kind else (100 << 20)


# --------------------------- tiled matmul + bias -----------------------------

def _matmul_bias_kernel(x_ref, w_ref, b_ref, o_ref, acc_ref):
    @pl.when(pl.program_id(2) == 0)
    def _():
        acc_ref[...] = jnp.zeros_like(acc_ref)

    acc_ref[...] += jnp.dot(x_ref[...], w_ref[...],
                            preferred_element_type=jnp.float32)

    @pl.when(pl.program_id(2) == pl.num_programs(2) - 1)
    def _():
        o_ref[...] = acc_ref[...] + b_ref[...].astype(jnp.float32)


def matmul_bias(x, w, b):
    """x:(M,K) @ w:(K,N) + b:(1,N) -> (M,N) f32, tiled + K-accumulating.

    Operands are cast to bf16 (MXU) and padded so every block is lane-dense;
    padding is sliced off outside.  For skinny-M calls (patch embed, fc head)
    tk is widened so grid-step overhead does not dominate the weight read.
    """
    M, K = x.shape
    _, N = w.shape
    tm, tn, tk = _default_matmul_tiles()
    Mp, Kp, Np = _round_up(M, 8), _round_up(K, 128), _round_up(N, 128)
    if Mp <= 64:
        tk = 4096   # skinny M: fewer sequential K steps, ~1 MiB weight blocks
    tm, tn, tk = min(tm, Mp), min(tn, Np), min(tk, Kp)
    Mp, Np, Kp = _round_up(Mp, tm), _round_up(Np, tn), _round_up(Kp, tk)

    xb = jnp.pad(x.astype(jnp.bfloat16), ((0, Mp - M), (0, Kp - K)))
    wb = jnp.pad(w.astype(jnp.bfloat16), ((0, Kp - K), (0, Np - N)))
    bb = jnp.pad(b.astype(jnp.float32), ((0, 0), (0, Np - N)))

    out = pl.pallas_call(
        _matmul_bias_kernel,
        out_shape=jax.ShapeDtypeStruct((Mp, Np), jnp.float32),
        grid=(Mp // tm, Np // tn, Kp // tk),
        in_specs=[pl.BlockSpec((tm, tk), lambda i, j, k: (i, k)),
                  pl.BlockSpec((tk, tn), lambda i, j, k: (k, j)),
                  pl.BlockSpec((1, tn), lambda i, j, k: (0, j))],
        out_specs=pl.BlockSpec((tm, tn), lambda i, j, k: (i, j)),
        scratch_shapes=[pltpu.VMEM((tm, tn), jnp.float32)],
        compiler_params=pltpu.CompilerParams(
            dimension_semantics=("parallel", "parallel", "arbitrary")),
    )(xb, wb, bb)
    return out[:M, :N]


# ------------------------ fused transformer encoder --------------------------

def _ln(v, g, b):
    mu = jnp.mean(v, axis=-1, keepdims=True)
    var = jnp.mean(jnp.square(v - mu), axis=-1, keepdims=True)
    return (v - mu) * jax.lax.rsqrt(var + EPS) * g + b


def _encoder_kernel(num_heads, t_real, ew_bf16,
                    x_in_ref,
                    ln1g, ln1b, wq, bq, wk, bk, wv, bv, wo_hm, bo,
                    ln2g, ln2b, w1, b1, w2, b2,
                    ng, nb,
                    out_ref):
    """One pre-norm transformer block per inner grid step.

    Grid = (batch_blocks, layers): the token block stays resident in VMEM as
    the output accumulator across the (inner, "arbitrary") layer axis while
    per-layer weights are streamed; batch blocks are megacore-parallel.
    """
    layer = pl.program_id(1)
    n_layers = pl.num_programs(1)

    @pl.when(layer == 0)
    def _():
        out_ref[...] = x_in_ref[...]

    x = out_ref[...]                                    # (Bb, Tp, D) f32 residual
    Bb, Tp, D = x.shape
    H = num_heads
    hd = D // H
    M = Bb * Tp
    ew = jnp.bfloat16 if ew_bf16 else jnp.float32       # elementwise dtype

    # -------- attention (pre-norm); scale pre-folded into Wq/bq --------
    hn = _ln(x, ln1g[0], ln1b[0])
    h2 = hn.reshape(M, D).astype(jnp.bfloat16)          # fold B*T into MXU M axis
    q = jnp.dot(h2, wq[0], preferred_element_type=jnp.float32) + bq[0]
    k = jnp.dot(h2, wk[0], preferred_element_type=jnp.float32) + bk[0]
    v = jnp.dot(h2, wv[0], preferred_element_type=jnp.float32) + bv[0]

    if t_real < Tp:                                     # mask padded key slots
        col = jax.lax.broadcasted_iota(jnp.int32, (Tp, Tp), 1)
        key_mask = jnp.where(col < t_real, 0.0, -1e30)[None]
    else:
        key_mask = None

    # Static head loop: live score buffer is (Bb, Tp, Tp); head merge folded
    # into per-head output-projection accumulation (no (H, M, D) intermediate).
    attn = jnp.zeros((M, D), jnp.float32)
    for h in range(H):
        lo, hi = h * hd, (h + 1) * hd
        qh = q[:, lo:hi].reshape(Bb, Tp, hd).astype(jnp.bfloat16)
        kh = k[:, lo:hi].reshape(Bb, Tp, hd).astype(jnp.bfloat16)
        vh = v[:, lo:hi].reshape(Bb, Tp, hd).astype(jnp.bfloat16)

        s = jnp.einsum('bqd,bkd->bqk', qh, kh,
                       preferred_element_type=jnp.float32)   # (Bb, Tp, Tp) f32
        if key_mask is not None:
            s = s + key_mask
        s = s - jnp.max(s, axis=-1, keepdims=True)            # max-subtract in f32
        p = jnp.exp(s.astype(ew))                              # exp in bf16 on v6e/v7x
        denom = jnp.sum(p.astype(jnp.float32), axis=-1, keepdims=True)
        inv = pl.reciprocal(denom, approx=True)                # EUP slot
        p = (p * inv.astype(p.dtype)).astype(jnp.bfloat16)

        o_h = jnp.einsum('bqk,bkd->bqd', p, vh,
                         preferred_element_type=jnp.float32)   # (Bb, Tp, hd)
        attn = attn + jnp.dot(o_h.reshape(M, hd).astype(jnp.bfloat16),
                              wo_hm[0, h],
                              preferred_element_type=jnp.float32)

    attn = attn + bo[0]
    x = x + attn.reshape(Bb, Tp, D)

    # -------- MLP (pre-norm) --------
    hn2 = _ln(x, ln2g[0], ln2b[0])
    hm = hn2.reshape(M, D).astype(jnp.bfloat16)
    mid = jnp.dot(hm, w1[0], preferred_element_type=jnp.float32) + b1[0]
    # GELU in bf16 where the VPU/EUP supports it; keeps the (M, DM) intermediate
    # half-size.  (tanh approx; PyTorch's default nn.GELU is exact erf.)
    mid = jax.nn.gelu(mid.astype(ew), approximate=True).astype(jnp.bfloat16)
    mlp = jnp.dot(mid, w2[0], preferred_element_type=jnp.float32) + b2[0]
    x = x + mlp.reshape(Bb, Tp, D)

    @pl.when(layer < n_layers - 1)
    def _():
        out_ref[...] = x

    @pl.when(layer == n_layers - 1)                     # fused final encoder.norm
    def _():
        out_ref[...] = _ln(x, ng[...], nb[...])


def run_encoder_stack(tokens, stacked, norm_g, norm_b, num_heads, t_real,
                      mlp_dim):
    """Run all transformer blocks + final norm as a single pallas_call."""
    B, Tp, D = tokens.shape
    L = stacked['wq'].shape[0]
    DM = mlp_dim
    H = num_heads
    hd = D // H
    ew_bf16 = _ew_bf16()

    # Shard the resident token block across TensorCores (v7x megacore).
    b_blk = B // 2 if (B >= 2 and B % 2 == 0) else 1
    Bn = B // b_blk
    M = b_blk * Tp

    def per_layer(*dims):                   # one layer slice per inner grid step
        nd = len(dims)
        return pl.BlockSpec((1,) + dims, lambda b, l: (l,) + (0,) * nd)

    in_specs = [
        pl.BlockSpec((b_blk, Tp, D), lambda b, l: (b, 0, 0)),   # tokens in
        per_layer(1, D), per_layer(1, D),                        # ln1 g/b
        per_layer(D, D), per_layer(1, D),                        # wq (pre-scaled), bq
        per_layer(D, D), per_layer(1, D),                        # wk, bk
        per_layer(D, D), per_layer(1, D),                        # wv, bv
        per_layer(H, hd, D), per_layer(1, D),                    # wo (head-major), bo
        per_layer(1, D), per_layer(1, D),                        # ln2 g/b
        per_layer(D, DM), per_layer(1, DM),                      # w1, b1
        per_layer(DM, D), per_layer(1, D),                       # w2, b2
        pl.BlockSpec((1, D), lambda b, l: (0, 0)),               # final norm g
        pl.BlockSpec((1, D), lambda b, l: (0, 0)),               # final norm b
    ]

    # VMEM budget from the actual live set:
    #   weights: double-buffered bf16 matmul weights + f32 biases/LN params
    #   activations: resident residual, hn/h2, q/k/v, attn, per-head scores,
    #                MLP mid (f32 pre-GELU + bf16 post-GELU), mlp out.
    ew_sz = 2 if ew_bf16 else 4
    w_bytes = 2 * (2 * (4 * D * D + 2 * D * DM) + 4 * (8 * D + 2 * DM))
    a_bytes = (4 * 2 * b_blk * Tp * D            # resident out block + layer-0 copy
               + 4 * 5 * M * D                   # hn, q, k, v, attn (f32)
               + (4 + ew_sz) * b_blk * Tp * Tp   # scores f32 + probs
               + (4 + ew_sz) * M * DM            # mid f32 + gelu(mid)
               + 4 * M * D)                      # mlp out
    # TODO(synk): if w_bytes + a_bytes ever exceeds the v7x cap at very large
    # dims, block the MLP over mlp_dim chunks instead of one (M, DM) matmul.
    vmem_limit = int(min(max(w_bytes + a_bytes + (8 << 20), 32 << 20),
                         _vmem_cap_bytes()))

    return pl.pallas_call(
        functools.partial(_encoder_kernel, num_heads, t_real, ew_bf16),
        out_shape=jax.ShapeDtypeStruct((B, Tp, D), jnp.float32),
        grid=(Bn, L),
        in_specs=in_specs,
        out_specs=pl.BlockSpec((b_blk, Tp, D), lambda b, l: (b, 0, 0)),
        compiler_params=pltpu.CompilerParams(
            dimension_semantics=("parallel", "arbitrary"),
            vmem_limit_bytes=vmem_limit),
    )(tokens,
      stacked['ln1_g'], stacked['ln1_b'],
      stacked['wq'], stacked['bq'],
      stacked['wk'], stacked['bk'],
      stacked['wv'], stacked['bv'],
      stacked['wo_hm'], stacked['bo'],
      stacked['ln2_g'], stacked['ln2_b'],
      stacked['w1'], stacked['b1'],
      stacked['w2'], stacked['b2'],
      norm_g, norm_b)


# ------------------------- parameters & forward ------------------------------

def init_params(key, *, C, ps, D, depth, heads, mlp_dim, P, n_class):
    T = P + 2                       # cls + dist + patch tokens (DeiT-style)
    hd = D // heads
    scale = 1.0 / (hd ** 0.5)       # attention scale, folded into Wq/bq below
    keys = iter(jax.random.split(key, 16 + 16 * depth))

    def w(shape, dtype=jnp.bfloat16, scl=0.02):
        return (scl * jax.random.normal(next(keys), shape)).astype(dtype)

    def zeros(shape):
        return jnp.zeros(shape, jnp.float32)

    def ones(shape):
        return jnp.ones(shape, jnp.float32)

    patch_dim = C * ps * ps
    params = dict(
        patch_size=ps, num_heads=heads, mlp_dim=mlp_dim,
        pe_w=w((patch_dim, D)), pe_b=zeros((1, D)),      # Conv2d(stride=ps) as matmul
        cls_token=w((1, 1, D), jnp.float32),
        dist_token=w((1, 1, D), jnp.float32),
        pos_embed=w((1, T, D), jnp.float32),
        norm_g=ones((1, D)), norm_b=zeros((1, D)),
        fc_w=w((T * D, n_class)), fc_b=zeros((1, n_class)),
    )

    def stack(fn):
        return jnp.stack([fn() for _ in range(depth)], axis=0)

    # Per-layer params stacked along a leading depth axis (bf16 weights,
    # f32 biases / LN params).  W_o stored head-major (heads, head_dim, D).
    # 1/sqrt(head_dim) is pre-folded into Wq (and would be into bq if nonzero),
    # so the kernel never multiplies q by the scale.
    params['blocks'] = dict(
        ln1_g=stack(lambda: ones((1, D))), ln1_b=stack(lambda: zeros((1, D))),
        wq=stack(lambda: (w((D, D)).astype(jnp.float32) * scale)
                 .astype(jnp.bfloat16)),
        bq=stack(lambda: zeros((1, D))),
        wk=stack(lambda: w((D, D))), bk=stack(lambda: zeros((1, D))),
        wv=stack(lambda: w((D, D))), bv=stack(lambda: zeros((1, D))),
        wo_hm=stack(lambda: w((D, D)).reshape(heads, hd, D)),
        bo=stack(lambda: zeros((1, D))),
        ln2_g=stack(lambda: ones((1, D))), ln2_b=stack(lambda: zeros((1, D))),
        w1=stack(lambda: w((D, mlp_dim))), b1=stack(lambda: zeros((1, mlp_dim))),
        w2=stack(lambda: w((mlp_dim, D))), b2=stack(lambda: zeros((1, D))),
    )
    return params


def evalnet_forward(params, img, perm_key, masking_ratio=0.0):
    B, C, Hh, Ww = img.shape
    ps = params['patch_size']
    P = (Hh // ps) * (Ww // ps)
    D = params['pe_w'].shape[1]

    # patch_embed: Conv2d(C, D, kernel=ps, stride=ps) == patch rearrange + matmul
    patches = img.reshape(B, C, Hh // ps, ps, Ww // ps, ps)
    patches = patches.transpose(0, 2, 4, 1, 3, 5).reshape(B * P, C * ps * ps)
    tokens = matmul_bias(patches, params['pe_w'], params['pe_b']).reshape(B, P, D)

    # random masking (identical to reference; ratio 0 keeps all tokens, permuted)
    num_masked = int(masking_ratio * P)
    rand = jax.random.uniform(perm_key, (B, P))
    unmasked = jnp.argsort(rand, axis=-1)[:, num_masked:]          # (B, U)
    U = P - num_masked
    tokens = jnp.take_along_axis(
        tokens, jnp.broadcast_to(unmasked[:, :, None], (B, U, D)), axis=1)

    cls_tok = jnp.broadcast_to(params['cls_token'] + params['pos_embed'][:, 0],
                               (B, 1, D))
    dist_tok = jnp.broadcast_to(params['dist_token'] + params['pos_embed'][:, 1],
                                (B, 1, D))
    tokens = jnp.concatenate([cls_tok, dist_tok, tokens], axis=1)  # (B, T, D)
    T = U + 2
    # pos_drop: dropout -> identity in eval mode.

    # Pad the sequence to a 128-lane multiple (lane-dense score / prob tensors);
    # padded key positions are masked inside the kernel.
    Tp = _round_up(T, 128)
    tokens = jnp.pad(tokens, ((0, 0), (0, Tp - T), (0, 0)))

    encoded = run_encoder_stack(tokens, params['blocks'],
                                params['norm_g'], params['norm_b'],
                                params['num_heads'], T, params['mlp_dim'])
    encoded = encoded[:, :T, :]

    latent = encoded.reshape(B, T * D)                  # flatten(start_dim=1)
    # NOTE: like the PyTorch reference, fc expects (P+2)*D features, so any
    # masking_ratio > 0 makes the head shapes mismatch (same as the original).
    return matmul_bias(latent, params['fc_w'], params['fc_b'])     # (B, n_class)


# ---------------------------------- main -------------------------------------

if __name__ == "__main__":
    B, C, Himg, Wimg = 2, 3, 16, 16
    ps, D, depth, heads, mlp_dim, n_class = 8, 32, 2, 4, 64, 10
    P = (Himg // ps) * (Wimg // ps)                     # 4 patch tokens

    root = jax.random.PRNGKey(0)
    k_img, k_params, k_perm = jax.random.split(root, 3)

    img = jax.random.normal(k_img, (B, C, Himg, Wimg), dtype=jnp.float32)
    params = init_params(k_params, C=C, ps=ps, D=D, depth=depth, heads=heads,
                         mlp_dim=mlp_dim, P=P, n_class=n_class)

    out = evalnet_forward(params, img, k_perm, masking_ratio=0.0)
    out = jax.block_until_ready(out)
    assert out.shape == (B, n_class)
    assert bool(jnp.all(jnp.isfinite(out)))
    print("KERNEL_OK")
</pallas_src>

<mosaic_0001>
module attributes {stable_mosaic.version = 11 : i64} {
  func.func @_matmul_bias_kernel(%arg0: i32, %arg1: i32, %arg2: i32, %arg3: memref<8x256xbf16, #tpu.memory_space<vmem>>, %arg4: memref<256x128xbf16, #tpu.memory_space<vmem>>, %arg5: memref<1x128xf32, #tpu.memory_space<vmem>>, %arg6: memref<8x128xf32, #tpu.memory_space<vmem>>, %arg7: memref<8x128xf32, #tpu.memory_space<vmem>>) attributes {dimension_semantics = [#tpu.dimension_semantics<parallel>, #tpu.dimension_semantics<parallel>, #tpu.dimension_semantics<arbitrary>], iteration_bounds = array<i64: 1, 1, 1>, scalar_prefetch = 0 : i64, scratch_operands = 1 : i64, tpu.core_type = #tpu.core_type<tc>, window_params = [{transform_indices = @transform_0, window_bounds = array<i64: 8, 256>}, {transform_indices = @transform_1, window_bounds = array<i64: 256, 128>}, {transform_indices = @transform_2, window_bounds = array<i64: 1, 128>}, {transform_indices = @transform_3, window_bounds = array<i64: 8, 128>}]} {
    %c0_i32 = arith.constant 0 : i32
    %0 = arith.cmpi eq, %arg2, %c0_i32 : i32
    %1 = arith.extui %0 : i1 to i32
    %c0_i32_0 = arith.constant 0 : i32
    %2 = arith.cmpi ne, %1, %c0_i32_0 : i32
    scf.if %2 {
      %cst_10 = arith.constant 0.000000e+00 : f32
      %12 = vector.broadcast %cst_10 : f32 to vector<8x128xf32>
      %c0_11 = arith.constant 0 : index
      %c0_12 = arith.constant 0 : index
      %13 = vector.load %arg7[%c0_11, %c0_12] : memref<8x128xf32, #tpu.memory_space<vmem>>, vector<8x128xf32>
      tpu.vector_store %arg7[%c0_11, %c0_12], %12 {strides = array<i32>} : memref<8x128xf32, #tpu.memory_space<vmem>>, vector<8x128xf32>,
    } else {
    }
    %c0 = arith.constant 0 : index
    %c0_1 = arith.constant 0 : index
    %3 = vector.load %arg7[%c0, %c0_1] : memref<8x128xf32, #tpu.memory_space<vmem>>, vector<8x128xf32>
    %c0_2 = arith.constant 0 : index
    %c0_3 = arith.constant 0 : index
    %4 = vector.load %arg3[%c0_2, %c0_3] : memref<8x256xbf16, #tpu.memory_space<vmem>>, vector<8x256xbf16>
    %c0_4 = arith.constant 0 : index
    %c0_5 = arith.constant 0 : index
    %5 = vector.load %arg4[%c0_4, %c0_5] : memref<256x128xbf16, #tpu.memory_space<vmem>>, vector<256x128xbf16>
    %cst = arith.constant dense<0.000000e+00> : vector<8x128xf32>
    %6 = tpu.matmul %4, %5, %cst {dimension_numbers = #tpu.dot_dimension_numbers<[1], [0], [0], [1], [0, 0, 1, 1], [], []>} : vector<8x256xbf16>, vector<256x128xbf16>, vector<8x128xf32> -> vector<8x128xf32>
    %7 = arith.addf %3, %6 : vector<8x128xf32>
    %c0_6 = arith.constant 0 : index
    %c0_7 = arith.constant 0 : index
    %8 = vector.load %arg7[%c0_6, %c0_7] : memref<8x128xf32, #tpu.memory_space<vmem>>, vector<8x128xf32>
    tpu.vector_store %arg7[%c0_6, %c0_7], %7 {strides = array<i32>} : memref<8x128xf32, #tpu.memory_space<vmem>>, vector<8x128xf32>,
    %c0_i32_8 = arith.constant 0 : i32
    %9 = arith.cmpi eq, %arg2, %c0_i32_8 : i32
    %10 = arith.extui %9 : i1 to i32
    %c0_i32_9 = arith.constant 0 : i32
    %11 = arith.cmpi ne, %10, %c0_i32_9 : i32
    scf.if %11 {
      %c0_10 = arith.constant 0 : index
      %c0_11 = arith.constant 0 : index
      %12 = vector.load %arg7[%c0_10, %c0_11] : memref<8x128xf32, #tpu.memory_space<vmem>>, vector<8x128xf32>
      %c0_12 = arith.constant 0 : index
      %c0_13 = arith.constant 0 : index
      %13 = vector.load %arg5[%c0_12, %c0_13] : memref<1x128xf32, #tpu.memory_space<vmem>>, vector<1x128xf32>
      %14 = vector.broadcast %13 : vector<1x128xf32> to vector<8x128xf32>
      %15 = arith.addf %12, %14 : vector<8x128xf32>
      %c0_14 = arith.constant 0 : index
      %c0_15 = arith.constant 0 : index
      %16 = vector.load %arg6[%c0_14, %c0_15] : memref<8x128xf32, #tpu.memory_space<vmem>>, vector<8x128xf32>
      tpu.vector_store %arg6[%c0_14, %c0_15], %15 {strides = array<i32>} : memref<8x128xf32, #tpu.memory_space<vmem>>, vector<8x128xf32>,
    } else {
    }
    return
  }
  func.func @transform_0(%arg0: i32, %arg1: i32, %arg2: i32) -> (i32, i32) {
    %c0_i32 = arith.constant 0 : i32
    return %arg0, %arg2 : i32, i32
  }
  func.func @transform_1(%arg0: i32, %arg1: i32, %arg2: i32) -> (i32, i32) {
    %c0_i32 = arith.constant 0 : i32
    return %arg2, %arg1 : i32, i32
  }
  func.func @transform_2(%arg0: i32, %arg1: i32, %arg2: i32) -> (i32, i32) {
    %c0_i32 = arith.constant 0 : i32
    %c0_i32_0 = arith.constant 0 : i32
    return %c0_i32, %arg1 : i32, i32
  }
  func.func @transform_3(%arg0: i32, %arg1: i32, %arg2: i32) -> (i32, i32) {
    %c0_i32 = arith.constant 0 : i32
    return %arg0, %arg1 : i32, i32
  }
}

</mosaic_0001>

<bundles_post_ra>
// kernel: tpu_custom_call.1
= control target key start
LH: loop header
LB: loop body
LE: loop exit
PB: predicated region body
PF: predicated region fallthrough
CT: control target
= control target key end

     0   :  { %8 = vsyncpa [#allocation4], 0  ;;  %s444_s0 = inlined_call_operand.hbm [shape: bf16[8,256], index: 0, kind: input, shape index: {}]   ;;  %s445_s1 = inlined_call_operand.hbm [shape: bf16[256,128], index: 1, kind: input, shape index: {}]   ;;  %s446_s2 = inlined_call_operand.vmem [shape: f32[1,128], index: 2, kind: input, shape index: {}]   ;;  %s447_s3 = inlined_call_operand.hbm [shape: f32[8,128], index: 3, kind: output, shape index: {}]  }
   0x1   :  { %9 = vsyncpa [#allocation7], 0 }
   0x2   :  { %10 = vsyncpa [#allocation5], 0  ;;  %s16_s14 = sshll.u32 %s444_s0, 4  ;;  %s407_s15 = smov [#allocation3]   ;;  %s17_s14 = int_to_ptr.hbm [resolvable:$true] %s16_s14 }
   0x3   :  { %s18_s16 = sshll.u32 %s407_s15, 4  ;;  %s26_s19 = sshll.u32 %s445_s1, 4  ;;  %s19_s16 = int_to_ptr.vmem [resolvable:$true] %s18_s16  ;;  %s27_s19 = int_to_ptr.hbm [resolvable:$true] %s26_s19 }
   0x4   :  { %21 = dma.hbm_to_vmem [thread:$0]  %s17_s14, 128, %s19_s16, [#allocation4]  }
   0x5   :  { %s408_s20 = smov [#allocation6]   ;;  %s409_s22 = smov 64  }
   0x6   :  { %s28_s21 = sshll.u32 %s408_s20, 4  ;;  %s410_s23 = smov 4   ;;  %s29_s21 = int_to_ptr.vmem [resolvable:$true] %s28_s21 }
   0x7   :  { %34 = dma.hbm_to_vmem [thread:$0]  %s27_s19, 2048, %s29_s21, [#allocation7], %s409_s22, %s409_s22, %s410_s23  }
   0x8   :  { %401 = dma.done.wait [#allocation4], 128  }
   0x9   :  { %402 = vsyncadd [#allocation4], 4294967168 }
   0xa   :  { %403 = dma.done.wait [#allocation7], 2048  }
   0xb   :  { %404 = vsyncadd [#allocation7], 4294965248  ;;  %v314_v0 = vld [vmem:[#allocation6 + $0x38] sm:$0xff]  ;;  %v313_v2 = vld [vmem:[#allocation6 + $0x30] sm:$0xff]  ;;  %s411_s24 = smov [#allocation8]   ;;  %s232_s28 = sshll.u32 %s447_s3, 4  ;;  %s233_s28 = int_to_ptr.hbm [resolvable:$true] %s232_s28 }
   0xc   :  { %v322_v1 = vld [vmem:[#allocation6 + $0x78] sm:$0xff]  ;;  %187 = vmatpush.bf16.msra.mxu0 %v314_v0  ;;  %v321_v3 = vld [vmem:[#allocation6 + $0x70] sm:$0xff]  ;;  %v312_v4 = vld [vmem:[#allocation6 + $0x28] sm:$0xff]  ;;  %s230_s25 = sshll.u32 %s411_s24, 4  ;;  %s231_s25 = int_to_ptr.vmem [resolvable:$true] %s230_s25 }
   0xd   :  { %200 = vmatpush.bf16.msra.mxu1 %v322_v1  ;;  %v320_v5 = vld [vmem:[#allocation6 + $0x68] sm:$0xff]  ;;  %v311_v6 = vld [vmem:[#allocation6 + $0x20] sm:$0xff]  ;;  %v310_v8 = vld [vmem:[#allocation6 + $0x18] sm:$0xff] }
   0xe   :  { %v319_v7 = vld [vmem:[#allocation6 + $0x60] sm:$0xff]  ;;  %v318_v9 = vld [vmem:[#allocation6 + $0x58] sm:$0xff]  ;;  %v309_v10 = vld [vmem:[#allocation6 + $0x10] sm:$0xff] }
   0xf   :  { %v317_v11 = vld [vmem:[#allocation6 + $0x50] sm:$0xff]  ;;  %v308_v12 = vld [vmem:[#allocation6 + $0x8] sm:$0xff]  ;;  %v51_v14 = vld [vmem:[#allocation3] sm:$0xff] }
  0x10   :  { %188 = vmatpush.bf16.msra.mxu0 %v313_v2  ;;  %v316_v13 = vld [vmem:[#allocation6 + $0x48] sm:$0xff]  ;;  %v85_v15 = vunpack.c.l.b16 %v51_v14  ;;  %v86_v16 = vunpack.c.h.b16 %v51_v14  ;;  %v307_v17 = vld [vmem:[#allocation6] sm:$0xff]  ;;  %v328_v21 = vld [vmem:[%s446_s2] ss:$0 sm:$0xff] }
  0x11   :  { %201 = vmatpush.bf16.msra.mxu1 %v321_v3  ;;  %v315_v18 = vld [vmem:[#allocation6 + $0x40] sm:$0xff] }
  0x12   :  { %v87_v19 = vpack.c.b16 %v85_v15, %v85_v15  ;;  %v88_v20 = vpack.c.b16 %v86_v16, %v86_v16 }
  0x14   :  { %189 = vmatpush.bf16.msra.mxu0 %v312_v4 }
  0x15   :  { %202 = vmatpush.bf16.msra.mxu1 %v320_v5 }
  0x18   :  { %190 = vmatpush.bf16.msra.mxu0 %v311_v6 }
  0x19   :  { %203 = vmatpush.bf16.msra.mxu1 %v319_v7 }
  0x1c   :  { %191 = vmatpush.bf16.msra.mxu0 %v310_v8 }
  0x1d   :  { %204 = vmatpush.bf16.msra.mxu1 %v318_v9 }
  0x20   :  { %192 = vmatpush.bf16.msra.mxu0 %v309_v10 }
  0x21   :  { %205 = vmatpush.bf16.msra.mxu1 %v317_v11 }
  0x24   :  { %193 = vmatpush.bf16.msra.mxu0 %v308_v12 }
  0x25   :  { %206 = vmatpush.bf16.msra.mxu1 %v316_v13 }
  0x28   :  { %194 = vmatpush.bf16.msra.mxu0 %v307_v17 }
  0x29   :  { %207 = vmatpush.bf16.msra.mxu1 %v315_v18 }
  0x2b   :  { %195 = vmatmul.bf16.vlgmr.msra.gmra.mxu0 %v87_v19 }
  0x2c   :  { %208 = vmatmul.bf16.vlgmr.msra.gmra.mxu1 %v88_v20 }
  0xa8   :  { %v196_v22 = vpop.f32.mrf.mxu0 }
  0xa9   :  { %v209_v23 = vpop.f32.mrf.mxu1 }
  0xaa   :  { %v210_v24 = vadd.f32 %v209_v23, %v196_v22 }
  0xac   :  { %v223_v25 = vadd.f32 %v328_v21, %v210_v24 }
  0xae   :  { %224 = vst [vmem:[#allocation8] sm:$0xff] %v223_v25 }
  0xaf   :  { %235 = dma.vmem_to_hbm [thread:$0]  %s231_s25, 128, %s233_s28, [#allocation5]  }
  0xb0   :  { %v198_v26 = vpop.f32.mrf.mxu0 }
  0xb1   :  { %v211_v27 = vpop.f32.mrf.mxu1 }
  0xb2   :  { %405 = dma.done.wait [#allocation5], 128  }
  0xb3   :  { %406 = vsyncadd [#allocation5], 4294967168 }
  0xb4   :  { %240 = vsyncpa [#allocation4], 1 }
  0xb5   :  { %241 = vsyncpa [#allocation7], 1 }
  0xb6   :  { %242 = vsyncpa [#allocation5], 1 }

</bundles_post_ra>
